<compile_context>
chip_gen: v7x
topology: tpu7x:2x2x1
jax: 0.10.0
libtpu: 0.0.40
codegen_flags: <defaults>
</compile_context>

<pallas_src>
import jax
import jax.numpy as jnp
from jax.experimental import pallas as pl
from jax.experimental.pallas import tpu as pltpu


# Per-input tile target for the tiled path (~4 MiB keeps each HBM-bound pass
# near roofline on v5e/v6e/v7x while double-buffered in+out stays ~16 MiB).
_TILE_BYTES = 4 * 1024 * 1024
# Per-batch slab ceiling (f32-equivalent bytes) for the fully fused path:
# in + out, double-buffered, is 4x the slab and must stay under the limit.
_FUSED_SLAB_F32_BYTES = 8 * 1024 * 1024
# Scoped VMEM limit: above v5e's 16 MiB default, under v7x's 64 MiB physical
# (review guidance: do not exceed ~48 MiB).
_VMEM_LIMIT_BYTES = 40 * 1024 * 1024


def _sublane_align(dtype):
    """Native sublane packing: 8 rows for 4-byte, 16 for 2-byte, 32 for 1-byte."""
    return max(8, 32 // jnp.dtype(dtype).itemsize)


def _pick_tile(dim, target, align):
    """Mosaic-legal tile for `dim`: an `align`-multiple divisor of `dim`
    (largest one <= target preferred, else smallest one above), or full dim."""
    if dim <= target:
        return dim
    t = (target // align) * align
    while t >= align:                       # largest aligned divisor <= target
        if dim % t == 0:
            return t
        t -= align
    t = (target // align + 1) * align       # smallest aligned divisor > target
    while t < dim:
        if dim % t == 0:
            return t
        t += align
    # TODO(synk): for pathological dims with no aligned divisor, pad on the
    # host instead of falling back to a full-dim block (VMEM-budget risk).
    return dim


def _excitation_col(p_col, w1t, b1c, w2t, b2c):
    """fc1 -> relu -> fc2 -> sigmoid in column form (features on sublanes).

    p_col: (C, 1) f32, w1t: (hid, C), b1c: (hid, 1), w2t: (Cb, hid),
    b2c: (Cb, 1).  Returns (Cb, 1) f32 = sigmoid(...) + 1, so the residual
    `x*e + x` collapses into a single multiply by (e + 1).
    """
    h = jnp.dot(w1t, p_col, preferred_element_type=jnp.float32) + b1c
    h = jnp.maximum(h, 0.0)
    e = jnp.dot(w2t, h, preferred_element_type=jnp.float32) + b2c
    return jax.nn.sigmoid(e) + 1.0


def squeeze_excitation(x_nchw, w1, b1, w2, b2, *,
                       fused_slab_budget_bytes=_FUSED_SLAB_F32_BYTES,
                       tile_bytes=_TILE_BYTES):
    """SE forward: x * sigmoid(fc2(relu(fc1(avgpool(x))))) + x.

    x_nchw: (B, C, H, W).  w1: (C, hid), b1: (hid,), w2: (hid, C), b2: (C,)
    (Linear weights stored as (in, out), i.e. transposed vs torch.nn.Linear.)
    """
    B, C, H, W = x_nchw.shape
    HW = H * W
    R = B * C
    hid = w1.shape[1]
    itemsize = jnp.dtype(x_nchw.dtype).itemsize
    align = _sublane_align(x_nchw.dtype)
    inv_hw = 1.0 / float(HW)

    x3 = x_nchw.reshape(B, C, HW)
    # Column-form weights (tiny; transposed once on the host, outside kernels).
    w1t = w1.T                                   # (hid, C)
    w2t = w2.T                                   # (C, hid)
    b1c = b1.reshape(hid, 1).astype(jnp.float32)
    b2c = b2.reshape(C, 1).astype(jnp.float32)

    # ------------- Path A: fully fused single kernel, grid over B -------------
    if C * HW * 4 <= fused_slab_budget_bytes:
        def _fused_kernel(x_ref, w1t_ref, b1c_ref, w2t_ref, b2c_ref, o_ref):
            xf = x_ref[...].astype(jnp.float32)                      # (C, HW)
            p_col = jnp.sum(xf, axis=-1, keepdims=True) * inv_hw     # (C, 1)
            e = _excitation_col(p_col, w1t_ref[...], b1c_ref[...],
                                w2t_ref[...], b2c_ref[...])          # (C, 1)
            o_ref[...] = (xf * e).astype(o_ref.dtype)

        out3 = pl.pallas_call(
            _fused_kernel,
            out_shape=jax.ShapeDtypeStruct((B, C, HW), x_nchw.dtype),
            grid=(B,),
            in_specs=[
                pl.BlockSpec((None, C, HW), lambda b: (b, 0, 0)),
                pl.BlockSpec((hid, C), lambda b: (0, 0)),
                pl.BlockSpec((hid, 1), lambda b: (0, 0)),
                pl.BlockSpec((C, hid), lambda b: (0, 0)),
                pl.BlockSpec((C, 1), lambda b: (0, 0)),
            ],
            out_specs=pl.BlockSpec((None, C, HW), lambda b: (b, 0, 0)),
            compiler_params=pltpu.CompilerParams(
                dimension_semantics=("parallel",),
                vmem_limit_bytes=_VMEM_LIMIT_BYTES),
            cost_estimate=pl.CostEstimate(
                flops=int(3 * B * C * HW),
                transcendentals=int(B * C),
                bytes_accessed=int(2 * B * C * HW * itemsize)),
        )(x3, w1t, b1c, w2t, b2c)
        return out3.reshape(B, C, H, W)

    # ---------------- Path B: tiled two-pass path (large slabs) ----------------
    # ---- pass 1: global average pool over HW, x viewed as (B*C, HW) ----
    x_flat = x_nchw.reshape(R, HW)

    tr_target = 256
    if R >= 2 * align:
        tr_target = min(tr_target, R // 2)   # >= 2 row blocks -> v7x megacore
    tr = _pick_tile(R, tr_target, align)
    thw = _pick_tile(HW, max(128, tile_bytes // max(1, tr * itemsize)), 128)
    grid1 = (R // tr, HW // thw)

    def _pool_kernel(x_ref, p_ref, acc_ref):
        k = pl.program_id(1)

        @pl.when(k == 0)
        def _():
            acc_ref[...] = jnp.zeros_like(acc_ref)

        # Full-width VPU add every step; the cross-lane reduce and the narrow
        # (tr, 1) store are deferred to once per row tile.
        acc_ref[...] += x_ref[...].astype(jnp.float32)

        @pl.when(k == pl.num_programs(1) - 1)
        def _():
            p_ref[...] = jnp.sum(acc_ref[...], axis=-1, keepdims=True) * inv_hw

    pooled = pl.pallas_call(
        _pool_kernel,
        out_shape=jax.ShapeDtypeStruct((R, 1), jnp.float32),
        grid=grid1,
        in_specs=[pl.BlockSpec((tr, thw), lambda r, k: (r, k))],
        out_specs=pl.BlockSpec((tr, 1), lambda r, k: (r, 0)),
        scratch_shapes=[pltpu.VMEM((tr, thw), jnp.float32)],
        compiler_params=pltpu.CompilerParams(
            dimension_semantics=("parallel", "arbitrary"),
            vmem_limit_bytes=_VMEM_LIMIT_BYTES),
        cost_estimate=pl.CostEstimate(
            flops=int(R * HW),
            transcendentals=0,
            bytes_accessed=int(R * HW * itemsize + R * 4)),
    )(x_flat)

    pooled3 = pooled.reshape(B, C, 1)        # per-batch channel columns, f32

    # ---- pass 2: fused excitation + elementwise scale ----
    tc_target = 256
    if B == 1 and C >= 2 * align:
        tc_target = min(tc_target, C // 2)   # keep a parallel axis with >= 2 blocks
    tc = _pick_tile(C, tc_target, align)
    thw2 = _pick_tile(HW, max(128, tile_bytes // max(1, tc * itemsize)), 128)
    grid2 = (B, C // tc, HW // thw2)

    def _scale_kernel(p_ref, w1t_ref, b1c_ref, w2t_ref, b2c_ref, x_ref,
                      o_ref, e_scr):
        hi = pl.program_id(2)

        @pl.when(hi == 0)
        def _():
            # Recompute the tiny excitation once per (batch, channel-block):
            # two matvecs + a sigmoid, negligible next to one tile's DMA.
            # Megacore-safe: only the hw axis is "arbitrary", so every
            # (b, c)-block a core owns starts at hi == 0.
            e_scr[...] = _excitation_col(p_ref[...], w1t_ref[...], b1c_ref[...],
                                         w2t_ref[...], b2c_ref[...])

        o_ref[...] = (x_ref[...].astype(jnp.float32)
                      * e_scr[...]).astype(o_ref.dtype)

    out3 = pl.pallas_call(
        _scale_kernel,
        out_shape=jax.ShapeDtypeStruct((B, C, HW), x_nchw.dtype),
        grid=grid2,
        in_specs=[
            pl.BlockSpec((None, C, 1), lambda b, c, k: (b, 0, 0)),    # pooled col
            pl.BlockSpec((hid, C), lambda b, c, k: (0, 0)),           # w1^T
            pl.BlockSpec((hid, 1), lambda b, c, k: (0, 0)),           # b1 col
            pl.BlockSpec((tc, hid), lambda b, c, k: (c, 0)),          # w2^T block
            pl.BlockSpec((tc, 1), lambda b, c, k: (c, 0)),            # b2 col block
            pl.BlockSpec((None, tc, thw2), lambda b, c, k: (b, c, k)),
        ],
        out_specs=pl.BlockSpec((None, tc, thw2), lambda b, c, k: (b, c, k)),
        scratch_shapes=[pltpu.VMEM((tc, 1), jnp.float32)],
        compiler_params=pltpu.CompilerParams(
            dimension_semantics=("parallel", "parallel", "arbitrary"),
            vmem_limit_bytes=_VMEM_LIMIT_BYTES),
        cost_estimate=pl.CostEstimate(
            flops=int(2 * R * HW),
            transcendentals=int(B * C),
            bytes_accessed=int(2 * R * HW * itemsize)),
    )(pooled3, w1t, b1c, w2t, b2c, x3)

    return out3.reshape(B, C, H, W)


def _reference(x_nchw, w1, b1, w2, b2):
    pooled = jnp.mean(x_nchw, axis=(2, 3))                 # (B, C)
    h = jnp.maximum(pooled @ w1 + b1, 0.0)
    e = jax.nn.sigmoid(h @ w2 + b2)
    return x_nchw * e[:, :, None, None] + x_nchw


def _make_inputs(B, C, H, W, ratio, key):
    hid = max(1, C // ratio)
    kx, kw1, kb1, kw2, kb2 = jax.random.split(key, 5)
    x = jax.random.normal(kx, (B, C, H, W), dtype=jnp.float32)
    # fc1: C -> hid, fc2: hid -> C, stored as (in, out) so row form is p @ W + b.
    w1 = jax.random.normal(kw1, (C, hid), dtype=jnp.float32) * 0.1
    b1 = jax.random.normal(kb1, (hid,), dtype=jnp.float32) * 0.1
    w2 = jax.random.normal(kw2, (hid, C), dtype=jnp.float32) * 0.1
    b2 = jax.random.normal(kb2, (C,), dtype=jnp.float32) * 0.1
    return x, w1, b1, w2, b2


if __name__ == "__main__":
    # Module config: in_channels == out_dim == C (required by the broadcast
    # x * excitation in the original forward), ratio = 2.

    # 1) Small shape -> fully fused single-kernel path.
    x, w1, b1, w2, b2 = _make_inputs(2, 4, 16, 16, 2, jax.random.PRNGKey(0))
    out = jax.block_until_ready(squeeze_excitation(x, w1, b1, w2, b2))
    ref = _reference(x, w1, b1, w2, b2)
    assert out.shape == x.shape
    assert jnp.allclose(out, ref, atol=1e-4, rtol=1e-4), "fused path mismatch"

    # 2) Slightly larger shape, forced through the tiled two-pass path so both
    #    code paths are compile- and correctness-checked.
    x2, w12, b12, w22, b22 = _make_inputs(2, 16, 32, 32, 2, jax.random.PRNGKey(1))
    out2 = jax.block_until_ready(
        squeeze_excitation(x2, w12, b12, w22, b22, fused_slab_budget_bytes=0))
    ref2 = _reference(x2, w12, b12, w22, b22)
    assert out2.shape == x2.shape
    assert jnp.allclose(out2, ref2, atol=1e-4, rtol=1e-4), "tiled path mismatch"

    print("KERNEL_OK")
</pallas_src>

<mosaic_0001>
module attributes {stable_mosaic.version = 11 : i64} {
  func.func @_fused_kernel(%arg0: i32, %arg1: memref<1x4x256xf32, #tpu.memory_space<vmem>>, %arg2: memref<2x4xf32, #tpu.memory_space<vmem>>, %arg3: memref<2x1xf32, #tpu.memory_space<vmem>>, %arg4: memref<4x2xf32, #tpu.memory_space<vmem>>, %arg5: memref<4x1xf32, #tpu.memory_space<vmem>>, %arg6: memref<1x4x256xf32, #tpu.memory_space<vmem>>) attributes {dimension_semantics = [#tpu.dimension_semantics<parallel>], iteration_bounds = array<i64: 2>, scalar_prefetch = 0 : i64, scratch_operands = 0 : i64, tpu.core_type = #tpu.core_type<tc>, window_params = [{transform_indices = @transform_0, window_bounds = array<i64: 1, 4, 256>}, {pipeline_mode = #tpu.pipeline_mode<synchronous>, transform_indices = @transform_1, window_bounds = array<i64: 2, 4>}, {pipeline_mode = #tpu.pipeline_mode<synchronous>, transform_indices = @transform_2, window_bounds = array<i64: 2, 1>}, {pipeline_mode = #tpu.pipeline_mode<synchronous>, transform_indices = @transform_3, window_bounds = array<i64: 4, 2>}, {pipeline_mode = #tpu.pipeline_mode<synchronous>, transform_indices = @transform_4, window_bounds = array<i64: 4, 1>}, {transform_indices = @transform_5, window_bounds = array<i64: 1, 4, 256>}]} {
    %c0 = arith.constant 0 : index
    %c0_0 = arith.constant 0 : index
    %c0_1 = arith.constant 0 : index
    %0 = vector.load %arg1[%c0, %c0_0, %c0_1] : memref<1x4x256xf32, #tpu.memory_space<vmem>>, vector<1x4x256xf32>
    %1 = vector.shape_cast %0 : vector<1x4x256xf32> to vector<4x256xf32>
    %cst = arith.constant dense<0.000000e+00> : vector<4xf32>
    %2 = vector.multi_reduction <add>, %1, %cst [1] : vector<4x256xf32> to vector<4xf32>
    %3 = vector.shape_cast %2 : vector<4xf32> to vector<4x1xf32>
    %cst_2 = arith.constant 3.906250e-03 : f32
    %4 = vector.broadcast %cst_2 : f32 to vector<4x1xf32>
    %5 = arith.mulf %3, %4 : vector<4x1xf32>
    %c0_3 = arith.constant 0 : index
    %c0_4 = arith.constant 0 : index
    %6 = vector.load %arg2[%c0_3, %c0_4] : memref<2x4xf32, #tpu.memory_space<vmem>>, vector<2x4xf32>
    %c0_5 = arith.constant 0 : index
    %c0_6 = arith.constant 0 : index
    %7 = vector.load %arg3[%c0_5, %c0_6] : memref<2x1xf32, #tpu.memory_space<vmem>>, vector<2x1xf32>
    %c0_7 = arith.constant 0 : index
    %c0_8 = arith.constant 0 : index
    %8 = vector.load %arg4[%c0_7, %c0_8] : memref<4x2xf32, #tpu.memory_space<vmem>>, vector<4x2xf32>
    %c0_9 = arith.constant 0 : index
    %c0_10 = arith.constant 0 : index
    %9 = vector.load %arg5[%c0_9, %c0_10] : memref<4x1xf32, #tpu.memory_space<vmem>>, vector<4x1xf32>
    %cst_11 = arith.constant dense<0.000000e+00> : vector<2x1xf32>
    %10 = tpu.matmul %6, %5, %cst_11 {dimension_numbers = #tpu.dot_dimension_numbers<[1], [0], [0], [1], [0, 0, 1, 1], [], []>} : vector<2x4xf32>, vector<4x1xf32>, vector<2x1xf32> -> vector<2x1xf32>
    %11 = arith.addf %10, %7 : vector<2x1xf32>
    %cst_12 = arith.constant 0.000000e+00 : f32
    %12 = vector.broadcast %cst_12 : f32 to vector<2x1xf32>
    %13 = arith.maximumf %11, %12 : vector<2x1xf32>
    %cst_13 = arith.constant dense<0.000000e+00> : vector<4x1xf32>
    %14 = tpu.matmul %8, %13, %cst_13 {dimension_numbers = #tpu.dot_dimension_numbers<[1], [0], [0], [1], [0, 0, 1, 1], [], []>} : vector<4x2xf32>, vector<2x1xf32>, vector<4x1xf32> -> vector<4x1xf32>
    %15 = arith.addf %14, %9 : vector<4x1xf32>
    %16 = arith.negf %15 : vector<4x1xf32>
    %17 = math.exp %16 : vector<4x1xf32>
    %cst_14 = arith.constant 1.000000e+00 : f32
    %18 = vector.broadcast %cst_14 : f32 to vector<4x1xf32>
    %19 = arith.addf %18, %17 : vector<4x1xf32>
    %20 = arith.divf %18, %19 : vector<4x1xf32>
    %cst_15 = arith.constant 1.000000e+00 : f32
    %21 = vector.broadcast %cst_15 : f32 to vector<4x1xf32>
    %22 = arith.addf %20, %21 : vector<4x1xf32>
    %23 = vector.broadcast %22 : vector<4x1xf32> to vector<4x256xf32>
    %24 = arith.mulf %1, %23 : vector<4x256xf32>
    %c0_16 = arith.constant 0 : index
    %c0_17 = arith.constant 0 : index
    %c0_18 = arith.constant 0 : index
    %25 = vector.load %arg6[%c0_16, %c0_17, %c0_18] : memref<1x4x256xf32, #tpu.memory_space<vmem>>, vector<1x4x256xf32>
    %26 = vector.shape_cast %25 : vector<1x4x256xf32> to vector<4x256xf32>
    %27 = vector.shape_cast %24 : vector<4x256xf32> to vector<1x4x256xf32>
    tpu.vector_store %arg6[%c0_16, %c0_17, %c0_18], %27 {strides = array<i32>} : memref<1x4x256xf32, #tpu.memory_space<vmem>>, vector<1x4x256xf32>,
    return
  }
  func.func @transform_0(%arg0: i32) -> (i32, i32, i32) {
    %c0_i32 = arith.constant 0 : i32
    %c0_i32_0 = arith.constant 0 : i32
    %c0_i32_1 = arith.constant 0 : i32
    return %arg0, %c0_i32, %c0_i32_0 : i32, i32, i32
  }
  func.func @transform_1(%arg0: i32) -> (i32, i32) {
    %c0_i32 = arith.constant 0 : i32
    %c0_i32_0 = arith.constant 0 : i32
    %c0_i32_1 = arith.constant 0 : i32
    return %c0_i32, %c0_i32_0 : i32, i32
  }
  func.func @transform_2(%arg0: i32) -> (i32, i32) {
    %c0_i32 = arith.constant 0 : i32
    %c0_i32_0 = arith.constant 0 : i32
    %c0_i32_1 = arith.constant 0 : i32
    return %c0_i32, %c0_i32_0 : i32, i32
  }
  func.func @transform_3(%arg0: i32) -> (i32, i32) {
    %c0_i32 = arith.constant 0 : i32
    %c0_i32_0 = arith.constant 0 : i32
    %c0_i32_1 = arith.constant 0 : i32
    return %c0_i32, %c0_i32_0 : i32, i32
  }
  func.func @transform_4(%arg0: i32) -> (i32, i32) {
    %c0_i32 = arith.constant 0 : i32
    %c0_i32_0 = arith.constant 0 : i32
    %c0_i32_1 = arith.constant 0 : i32
    return %c0_i32, %c0_i32_0 : i32, i32
  }
  func.func @transform_5(%arg0: i32) -> (i32, i32, i32) {
    %c0_i32 = arith.constant 0 : i32
    %c0_i32_0 = arith.constant 0 : i32
    %c0_i32_1 = arith.constant 0 : i32
    return %arg0, %c0_i32, %c0_i32_0 : i32, i32, i32
  }
}

</mosaic_0001>

<bundles_post_ra>
// kernel: tpu_custom_call.1
= control target key start
LH: loop header
LB: loop body
LE: loop exit
PB: predicated region body
PF: predicated region fallthrough
CT: control target
= control target key end

     0   :  { %10 = vsyncpa [#allocation3], 0  ;;  %s923_s0 = inlined_call_operand.hbm [shape: f32[2,4,256], index: 0, kind: input, shape index: {}]   ;;  %s924_s1 = inlined_call_operand.vmem [shape: f32[2,4], index: 1, kind: input, shape index: {}]   ;;  %s925_s2 = inlined_call_operand.vmem [shape: f32[2,1], index: 2, kind: input, shape index: {}]   ;;  %s926_s3 = inlined_call_operand.vmem [shape: f32[4,2], index: 3, kind: input, shape index: {}]   ;;  %s927_s4 = inlined_call_operand.vmem [shape: f32[4,1], index: 4, kind: input, shape index: {}]   ;;  %s928_s5 = inlined_call_operand.hbm [shape: f32[2,4,256], index: 5, kind: output, shape index: {}]  }
   0x1   :  { %12 = vsyncpa [#allocation3 + $0x1], 0 }
   0x2   :  { %13 = vsyncpa [#allocation4], 0 }
   0x3   :  { %15 = vsyncpa [#allocation4 + $0x1], 0  ;;  %s743_s18 = smov 0   ;;  %s745_s19 = smov 0  }
   0x4   :  { %s747_s20 = smov 0   ;;  %s749_s21 = smov 0  }
   0x5 LB: > { %s764_s22 = sadd.s32 4294967295, %s705_s21   ;;  %s518_s23 = sadd.s32 4294967294, %s705_s21   ;;  %s705_s21 = sphi %s749_s21, %s943_s21   ;;  %s701_s20 = sphi %s747_s20, %s942_s20   ;;  %s697_s19 = sphi %s745_s19, %s941_s19   ;;  %s693_s18 = sphi %s743_s18, %s940_s18  }
   0x6   : > { %s768_s24 = sadd.s32 1, %s705_s21   ;;  %s28_s25 = sadd.s32 1, %s701_s20 }
   0x7   : > { %s25_s26 = ssub.s32 %s705_s21, %s768_s24  ;;  %p35_p0 = scmp.ne.s32.totalorder %s701_s20, %s697_s19 }
   0x8   : > { %p26_p1 = scmp.eq.s32.totalorder %s25_s26, 0  ;;  %p36_p2 = scmp.eq.s32.totalorder %s705_s21, 0 }
   0x9   : > { %p41_p3 = scmp.ne.s32.totalorder %s697_s19, %s693_s18  ;;  %p42_p4 = scmp.eq.s32.totalorder %s764_s22, 0 }
   0xa   : > { %s780_s27 = scalar_select %p26_p1, %s701_s20, %s28_s25  }
   0xb   : > { %p782_p5 = por %p36_p2, %p35_p0  ;;  %p786_p6 = por %p42_p4, %p41_p3 }
   0xc   : > { %p149_p7 = scmp.eq.s32.totalorder %s764_s22, 1  ;;  %p155_p8 = scmp.eq.s32.totalorder %s518_s23, 1 }
   0xd   : > { %p565_p10 = scmp.lt.s32.totalorder %s705_s21, 2  ;;  %s187_s7 = sand.u32 1, %s701_s20  }
   0xe   : > { %p793_p11 = por %p149_p7, %p35_p0  ;;  %p797_p12 = por %p155_p8, %p41_p3 }
   0xf   : > { %s537_s8 = sshll.u32 %s705_s21, 7  ;;  %s521_s9 = sshll.u32 %s187_s7, 3 }
  0x10   : > { %s932_s30 = scalar_select %p793_p11, 1, 0 }
  0x11   : > { %s933_s6 = scalar_select %p797_p12, 1, 0 }
  0x12   : > { %s806_s12 = scalar_lea.hbm %s923_s0, %s537_s8  ;;  %s191_s13 = scalar_lea.vmem [#allocation2], %s521_s9 }
  0x13   : > { %s199_s14 = sshll.u32 %s191_s13, 4  ;;  %p810_p13 = pnand %p565_p10, %p782_p5  ;;  %s814_s14 = int_to_ptr.vmem [resolvable:$true] %s199_s14 }
  0x14   : > { %s188_s16 = scalar_lea.sflag [#allocation3], %s187_s7  ;;  %s609_s17 = scalar_lea.hbm %s806_s12, 128 }
  0x15   : > { %p610_p2 = scmp.ne.s32.totalorder %s806_s12, %s609_s17  ;;  %p611_p3 = pneg %p810_p13 }
  0x16   : > { %s614_s26 = scalar_lea.hbm %s923_s0, 256  ;;  %p615_p5 = scmp.lt.u32.totalorder %s806_s12, %s923_s0 }
  0x17   : > { %p612_p4 = pnand %p611_p3, %p610_p2  ;;  %p616_p8 = scmp.lt.u32.totalorder %s614_s26, %s609_s17 }
  0x18   : > { %p618_p9 = scmp.lt.u32.totalorder %s609_s17, %s806_s12 }
  0x19   : > { %p613_p7 = pneg %p612_p4  ;;  %p617_p10 = por %p616_p8, %p615_p5 }
  0x1b   : > { %p619_p0 = por %p618_p9, %p617_p10 }
  0x1d   : > { %p620_p1 = pnand %p619_p0, %p613_p7 }
  0x1f   : > { %623 = shalt.err (!%p620_p1)
}
  0x20   : > { %s624_s7 = scalar_lea.vmem %s814_s14, 128  ;;  %s707_s9 = smov [#allocation2]  }
  0x21   : > { %p625_p2 = scmp.ne.s32.totalorder %s814_s14, %s624_s7  ;;  %s629_s10 = sshll.u32 %s707_s9, 4  ;;  %s630_s10 = int_to_ptr.vmem [resolvable:$false] %s629_s10 }
  0x22   : > { %s631_s11 = scalar_lea.vmem %s630_s10, 256  ;;  %p632_p11 = scmp.lt.s32.totalorder %s814_s14, %s630_s10 }
  0x23   : > { %p627_p4 = pnand %p625_p2, %p611_p3  ;;  %p633_p5 = scmp.lt.s32.totalorder %s631_s11, %s624_s7 }
  0x25   : > { %p628_p12 = pneg %p627_p4  ;;  %p634_p8 = por %p633_p5, %p632_p11 }
  0x27   : > { %p635_p9 = pnand %p634_p8, %p628_p12 }
  0x29   : > { %638 = shalt.err (!%p635_p9)
}
  0x2a   : > { %560 = dma.hbm_to_vmem [thread:$0]  (!%p810_p13), %s806_s12, 128, %s814_s14, %s188_s16  }
  0x2b   : > { %p935_p0 = scmp.lt.s32.totalorder %s705_s21, 3  ;;  %p936_p1 = scmp.ge.s32.totalorder %s705_s21, 1 }
  0x2d   : > { %p205_p3 = pnand %p936_p1, %p935_p0 }
  0x2e   : > { %s848_s13 = sand.u32 (!%p205_p3), 1, %s697_s19  }
  0x2f   : > { %208 = sbr.rel (%p205_p3) target bundleno = 811 (0x32b), region = 40  ;;  %s525_s17 = sshll.u32 (!%p205_p3), %s848_s13, 3 }
  0x30   : > { %s211_s23 = scalar_lea.sflag (!%p205_p3), [#allocation3], %s848_s13  ;;  %s214_s15 = scalar_lea.vmem (!%p205_p3), [#allocation2], %s525_s17 }
  0x36   : > { %684 = dma.done.wait (%p786_p6), %s211_s23, 128  }
  0x37   : > { %686 = vsyncadd (%p786_p6), %s211_s23, 4294967168  ;;  %vm245_vm0 = vcmask 1043456   ;;  %v241_v0 = vld [vmem:[%s214_s15] sm:$0xff]  ;;  %v708_v5 = vmov 0.0   ;;  %vm709_vm1 = vmmov 0   ;;  %vm256_vm2 = vcmask 31744  }
  0x38   : > { %v243_v1 = vcombine.high %v241_v0, %v241_v0  ;;  %v246_v2 = vsel %vm245_vm0, %v241_v0, 0.0  ;;  %543 = vmatprep.subr.mxu0 %v708_v5  ;;  %548 = vmatprep.subr.mxu1 %v708_v5  ;;  %v252_v8 = vld [vmem:[%s924_s1] sm:$0x3]  ;;  %vm338_vm3 = vcmask 1041408   ;;  %vm334_vm4 = vcmask 15360   ;;  %s538_s7 = sshll.u32 %s764_s22, 7 }
  0x39   : > { %545 = vmatprep.mubr.msk.f32.mxu0 %vm709_vm1, %v708_v5  ;;  %550 = vmatprep.mubr.msk.f32.mxu1 %vm709_vm1, %v708_v5  ;;  %v253_v9 = vld [vmem:[%s925_s2] sm:$0x3]  ;;  %v710_v15 = vmov 0   ;;  %v711_v25 = vmov 839922192   ;;  %v426_v27 = vlaneseq  ;;  %s240_s9 = scalar_lea.vmem [#allocation5], %s525_s17  ;;  %s879_s15 = scalar_lea.hbm %s928_s5, %s538_s7 }
  0x3a   : > { %v247_v3 = vsel %vm245_vm0, %v243_v1, 0.0  ;;  %v254_v14 = vld [vmem:[%s926_s3] sm:$0xf]  ;;  %603 = vset.pattern.permute.xlu0 %v710_v15  ;;  %v424_v26 = vunpack.c.l.s4 %v711_v25  ;;  %s448_s10 = sshll.u32 %s240_s9, 4  ;;  %s434_s12 = scalar_lea.sflag [#allocation4], %s848_s13  ;;  %s881_s10 = int_to_ptr.vmem [resolvable:$true] %s448_s10 }
  0x3b   : > { %v248_v4 = vadd.f32 %v247_v3, %v246_v2  ;;  %v255_v16 = vld [vmem:[%s927_s4] sm:$0xf]  ;;  %v427_v29 = vshrl.u32 %v426_v27, 7  ;;  %s639_s29 = scalar_lea.vmem %s881_s10, 128  ;;  %p937_p11 = scmp.ne.s32.totalorder %s932_s30, 0 }
  0x3c   : > { %v425_v28 = vunpack.c.0.s8 %v424_v26  ;;  %p640_p6 = scmp.ne.s32.totalorder %s881_s10, %s639_s29  ;;  %s712_s22 = smov [#allocation5]  }
  0x3d   : > { %249 = vadd.xlane.f32.xlu0 %v248_v4  ;;  %s643_s17 = sshll.u32 %s712_s22, 4  ;;  %s644_s17 = int_to_ptr.vmem [resolvable:$false] %s643_s17 }
  0x3e   : > { %v428_v30 = vsub.s32 %v425_v28, %v427_v29  ;;  %p641_p12 = pnand %p640_p6, %p937_p11  ;;  %s645_s14 = scalar_lea.vmem %s644_s17, 256 }
  0x3f   : > { %p646_p7 = scmp.lt.s32.totalorder %s881_s10, %s644_s17  ;;  %p647_p10 = scmp.lt.s32.totalorder %s645_s14, %s639_s29 }
  0x40   : > { %p642_p13 = pneg %p641_p12 }
  0x41   : > { %p648_p2 = por %p647_p10, %p646_p7 }
  0x43   : > { %p649_p4 = pnand %p648_p2, %p642_p13 }
  0xca   : > { %v250_v6 = vpop.xlane.xlu0 %249 }
  0xcb   : > { %v251_v7 = vmul.f32 0.00390625, %v250_v6 }
  0xcd   : > { %544 = vmatpush3.msk.msra.mxu0 %vm245_vm0, %v251_v7 }
  0xce   : > { %546 = vmatmul.mubr.msk.f32.vlgmr.msra.gmra.mrb[0].mxu0 %vm256_vm2, %v252_v8 }
 0x1a1   : > { %v329_v10 = vpop.f32.mrb[0].mxu0 }
 0x1a2   : > { %v330_v11 = vadd.f32 %v329_v10, %v253_v9  ;;  %v547_v12 = vpop.f32.mrb[1].mxu0 }
 0x1a4   : > { %v333_v13 = vmax.f32 %v330_v11, 0.0 }
 0x1a6   : > { %549 = vmatpush3.msk.msra.mxu1 %vm338_vm3, %v333_v13 }
 0x1a7   : > { %551 = vmatmul.mubr.msk.f32.vlgmr.msra.gmra.mrb[0].mxu1 %vm334_vm4, %v254_v14 }
 0x27a   : > { %v408_v17 = vpop.f32.mrb[0].mxu1 }
 0x27b   : > { %v409_v18 = vadd.f32 %v408_v17, %v255_v16  ;;  %v552_v19 = vpop.f32.mrb[1].mxu1 }
 0x27d   : > { %v531_v20 = vmul.f32 -1.442695, %v409_v18 }
 0x27f   : > { %605 = vpow2.f32 %v531_v20 }
 0x289   : > { %v606_v21 = vpop.eup %605 }
 0x28a   : > { %v415_v22 = vadd.f32 1.0, %v606_v21 }
 0x28c   : > { %607 = vrcp.f32 %v415_v22 }
 0x296   : > { %v608_v23 = vpop.eup %607 }
 0x297   : > { %v418_v24 = vadd.f32 1.0, %v608_v23 }
 0x299   : > { %421 = vperm.xlu0 %603, %v418_v24  }
 0x318   : > { %v422_v31 = vpop.permute.xlu0 %421 }
 0x319   : > { %v429_v32 = vrot.slane %v422_v31, %v428_v30 }
 0x31b   : > { %v431_v33 = vmul.f32 %v429_v32, %v241_v0 }
 0x31d   : > { %432 = vst [vmem:[%s240_s9] sm:$0xff] %v431_v33 }
 0x31e   : > { %652 = shalt.err (!%p649_p4)
}
 0x31f   : > { %s653_s13 = scalar_lea.hbm %s879_s15, 128  ;;  %s657_s26 = scalar_lea.hbm %s928_s5, 256 }
 0x320   : > { %p654_p5 = scmp.ne.s32.totalorder %s879_s15, %s653_s13  ;;  %p658_p0 = scmp.lt.u32.totalorder %s879_s15, %s928_s5 }
 0x321   : > { %p659_p1 = scmp.lt.u32.totalorder %s657_s26, %s653_s13  ;;  %p661_p6 = scmp.lt.u32.totalorder %s653_s13, %s879_s15 }
 0x322   : > { %p655_p8 = pnand %p654_p5, %p937_p11 }
 0x323   : > { %p660_p3 = por %p659_p1, %p658_p0 }
 0x324   : > { %p656_p9 = pneg %p655_p8 }
 0x325   : > { %p662_p12 = por %p661_p6, %p660_p3 }
 0x327   : > { %p663_p13 = pnand %p662_p12, %p656_p9 }
 0x329   : > { %666 = shalt.err (!%p663_p13)
}
 0x32a   : > { %555 = dma.vmem_to_hbm [thread:$0]  (%p937_p11), %s881_s10, 128, %s879_s15, %s434_s12  }
 0x32b PF: > { %s460_s7 = sand.u32 1, %s693_s18   ;;  %p938_p7 = scmp.ne.s32.totalorder %s933_s6, 0 }
 0x32c   : > { %p939_p10 = scmp.ge.s32.totalorder %s705_s21, 2  ;;  %s461_s9 = scalar_lea.sflag [#allocation4], %s460_s7 }
 0x32e   : > { %p562_p2 = pnand %p939_p10, %p938_p7 }
 0x330   : > { %688 = dma.done.wait (!%p562_p2), %s461_s9, 128  }
 0x331   : > { %690 = vsyncadd (!%p562_p2), %s461_s9, 4294967168  ;;  %p18_p4 = scmp.ge.s32.totalorder %s768_s24, 4   ;;  %s940_s18 = smov %s697_s19 }
 0x332   : > { %s941_s19 = smov %s701_s20  ;;  %s942_s20 = smov %s780_s27 }
 0x333   : > { %s943_s21 = smov %s768_s24  ;;  %20 = sbr.rel (!%p18_p4) target bundleno = 5 (0x5), region = 85 }
 0x33a   :  { %466 = vsyncpa [#allocation3], 1 }
 0x33b   :  { %468 = vsyncpa [#allocation3 + $0x1], 1 }
 0x33c   :  { %469 = vsyncpa [#allocation4], 1 }
 0x33d   :  { %471 = vsyncpa [#allocation4 + $0x1], 1 }

</bundles_post_ra>
